<compile_context>
chip_gen: v7x
topology: tpu7x:2x2x1
jax: 0.10.0
libtpu: 0.0.40
codegen_flags: <defaults>
</compile_context>

<pallas_src>
import math

import jax
import jax.numpy as jnp
from jax.experimental import pallas as pl
from jax.experimental.pallas import tpu as pltpu

EPS = 1e-09


# -----------------------------------------------------------------------------
# Hardware queries (best effort; safe fallbacks).
# -----------------------------------------------------------------------------
def _vmem_budget_bytes():
    cap = 64 * 1024 * 1024          # conservative default (v7x physical VMEM)
    try:
        info = pltpu.get_tpu_info()
        c = int(getattr(info, "vmem_capacity_bytes", 0))
        if c > 0:
            cap = c
    except Exception:
        pass
    # Leave headroom for compiler-internal scratch / pipeline bookkeeping.
    return max(16 * 1024 * 1024, cap - 8 * 1024 * 1024)


def _num_tensorcores_per_chip():
    try:
        kind = jax.devices()[0].device_kind.lower()
    except Exception:
        return 1
    return 2 if "v7" in kind else 1


def _block_spec(block_shape, index_map, *, buffers=None):
    """BlockSpec with optional N-deep pipelining (falls back if unsupported)."""
    if buffers is not None and hasattr(pl, "Buffered"):
        try:
            return pl.BlockSpec(block_shape, index_map,
                                pipeline_mode=pl.Buffered(buffers))
        except Exception:
            pass
    return pl.BlockSpec(block_shape, index_map)


# -----------------------------------------------------------------------------
# Resident path: one batch element's whole (T, C) slab lives in VMEM.
# -----------------------------------------------------------------------------
def _gln_resident_kernel(x_ref, gamma_ref, beta_ref, o_ref):
    # x_ref: (Tf, Cf) slab for the current batch element; gamma/beta: (1, Cf)
    xf = x_ref[...].astype(jnp.float32)
    n = jnp.float32(xf.size)
    # Two-stage reduce: per-column sums (lockstep VPU adds across vregs), then
    # a single lane reduce.
    col = jnp.sum(xf, axis=0, keepdims=True)                    # (1, Cf)
    mean = jnp.sum(col) / n
    # Exact two-pass variance; the centered value is only live for this reduce.
    xc = xf - mean
    colv = jnp.sum(xc * xc, axis=0, keepdims=True)              # (1, Cf)
    var = jnp.sum(colv) / n
    inv = jax.lax.rsqrt(var + EPS)                              # EUP
    scale = gamma_ref[...].astype(jnp.float32) * inv            # (1, Cf)
    shift = beta_ref[...].astype(jnp.float32) - mean * scale    # (1, Cf)
    # Fused affine from the ORIGINAL slab: 1 mul + 1 add per element, no
    # full-slab centered temporary kept live up to the store.
    o_ref[...] = (xf * scale + shift).astype(o_ref.dtype)


def _gln_resident(x, gamma2, beta2, *, vmem_cap):
    B, Tf, Cf = x.shape
    io_bytes = Tf * Cf * jnp.dtype(x.dtype).itemsize
    f32_bytes = Tf * Cf * 4
    # in/out double buffers + ~2 f32 working slabs + margin, capped per-gen.
    vmem_limit = int(min(vmem_cap,
                         max(16 * 1024 * 1024,
                             4 * io_bytes + 3 * f32_bytes + 2 * 1024 * 1024)))
    return pl.pallas_call(
        _gln_resident_kernel,
        out_shape=jax.ShapeDtypeStruct((B, Tf, Cf), x.dtype),
        grid_spec=pltpu.PrefetchScalarGridSpec(
            num_scalar_prefetch=0,
            grid=(B,),
            in_specs=[
                pl.BlockSpec((None, Tf, Cf), lambda b: (b, 0, 0)),
                pl.BlockSpec((1, Cf), lambda b: (0, 0)),
                pl.BlockSpec((1, Cf), lambda b: (0, 0)),
            ],
            out_specs=pl.BlockSpec((None, Tf, Cf), lambda b: (b, 0, 0)),
        ),
        compiler_params=pltpu.CompilerParams(
            dimension_semantics=("parallel",),
            vmem_limit_bytes=vmem_limit,
        ),
    )(x, gamma2, beta2)


# -----------------------------------------------------------------------------
# Tiled two-pass path: for slabs that do not fit the resident VMEM budget
# (or to feed both TensorCores when B is tiny on dual-core chips).
# -----------------------------------------------------------------------------
def _gln_stats_kernel(x_ref, sum_ref, sq_ref):
    # x_ref: (tile_t, Cf).  Per-tile partial sums on a fully parallel grid:
    # no cross-step accumulation, so both v7x TCs are usable even at B == 1.
    xf = x_ref[...].astype(jnp.float32)
    col = jnp.sum(xf, axis=0, keepdims=True)        # VPU adds across vregs
    colsq = jnp.sum(xf * xf, axis=0, keepdims=True)
    sum_ref[...] = jnp.sum(col).reshape(1, 1)       # single lane reduce each
    sq_ref[...] = jnp.sum(colsq).reshape(1, 1)


def _gln_norm_kernel(x_ref, scale_ref, shift_ref, o_ref):
    xf = x_ref[...].astype(jnp.float32)
    o_ref[...] = (xf * scale_ref[...] + shift_ref[...]).astype(o_ref.dtype)


def _pick_tile_t(Tf, Cf, itemsize, vmem_cap):
    row_bytes = Cf * max(itemsize, 4)
    # ~3 input buffers + 2 output buffers + f32 temps per tile must fit the
    # per-generation budget; cap rows at 4096 (per-step overhead negligible).
    budget = max(8 * row_bytes, vmem_cap // 10)
    tile_max = max(8, min(4096, (budget // row_bytes) // 8 * 8))
    start = (min(tile_max, Tf) // 8) * 8
    for cand in range(start, 7, -8):
        if Tf % cand == 0:
            return cand
    # No multiple-of-8 divisor: caller zero-pads T up to a tile multiple
    # instead of falling back to a full-slab block.
    return min(tile_max, ((Tf + 7) // 8) * 8)


def _gln_tiled(x, gamma2, beta2, *, true_n, vmem_cap, tile_t=None):
    B, Tf, Cf = x.shape
    itemsize = jnp.dtype(x.dtype).itemsize
    if tile_t is None:
        tile_t = _pick_tile_t(Tf, Cf, itemsize, vmem_cap)
    Tp = ((Tf + tile_t - 1) // tile_t) * tile_t
    if Tp != Tf:
        # Zero rows contribute nothing to sum / sumsq; mean/var divide by the
        # true element count.  Only taken when T has no usable divisor.
        x = jnp.pad(x, ((0, 0), (0, Tp - Tf), (0, 0)))
    nT = Tp // tile_t

    tile_f32 = tile_t * Cf * 4
    vmem_limit = int(min(vmem_cap,
                         max(16 * 1024 * 1024, 8 * tile_f32 + 2 * 1024 * 1024)))

    # Phase 1: per-tile partial sums, fully parallel, combined in JAX.
    sums, sqs = pl.pallas_call(
        _gln_stats_kernel,
        out_shape=(jax.ShapeDtypeStruct((B, nT, 1, 1), jnp.float32),
                   jax.ShapeDtypeStruct((B, nT, 1, 1), jnp.float32)),
        grid_spec=pltpu.PrefetchScalarGridSpec(
            num_scalar_prefetch=0,
            grid=(B, nT),
            in_specs=[_block_spec((None, tile_t, Cf), lambda b, t: (b, t, 0),
                                  buffers=3)],
            out_specs=(pl.BlockSpec((None, None, 1, 1),
                                    lambda b, t: (b, t, 0, 0)),
                       pl.BlockSpec((None, None, 1, 1),
                                    lambda b, t: (b, t, 0, 0))),
        ),
        compiler_params=pltpu.CompilerParams(
            dimension_semantics=("parallel", "parallel"),
            vmem_limit_bytes=vmem_limit,
        ),
    )(x)

    n = jnp.float32(true_n)
    total = jnp.sum(sums, axis=(1, 2, 3))                    # (B,)
    totsq = jnp.sum(sqs, axis=(1, 2, 3))                     # (B,)
    mean = total / n
    # NOTE: E[x^2] - mean^2 (clamped) can lose precision when |mean| >> std;
    # the resident path keeps the exact two-pass formula.
    var = jnp.maximum(totsq / n - mean * mean, 0.0)
    inv = jax.lax.rsqrt(var + EPS)
    scale = gamma2[None].astype(jnp.float32) * inv[:, None, None]   # (B,1,Cf)
    shift = beta2[None].astype(jnp.float32) - mean[:, None, None] * scale

    # Phase 2: fully parallel tiled fused-affine normalize.
    out = pl.pallas_call(
        _gln_norm_kernel,
        out_shape=jax.ShapeDtypeStruct((B, Tp, Cf), x.dtype),
        grid_spec=pltpu.PrefetchScalarGridSpec(
            num_scalar_prefetch=0,
            grid=(B, nT),
            in_specs=[
                _block_spec((None, tile_t, Cf), lambda b, t: (b, t, 0),
                            buffers=3),
                pl.BlockSpec((None, 1, Cf), lambda b, t: (b, 0, 0)),
                pl.BlockSpec((None, 1, Cf), lambda b, t: (b, 0, 0)),
            ],
            out_specs=pl.BlockSpec((None, tile_t, Cf), lambda b, t: (b, t, 0)),
        ),
        compiler_params=pltpu.CompilerParams(
            dimension_semantics=("parallel", "parallel"),
            vmem_limit_bytes=vmem_limit,
        ),
    )(x, scale, shift)

    if Tp != Tf:
        out = out[:, :Tf]
    return out


# -----------------------------------------------------------------------------
# Public wrapper.
# -----------------------------------------------------------------------------
def global_layer_norm(x, gamma, beta, *, max_resident_bytes=None, tile_t=None):
    """x: (B, T, C); gamma, beta: broadcastable to (1, 1, C)."""
    B, T, C = x.shape
    gamma2 = jnp.asarray(gamma).reshape(1, C)
    beta2 = jnp.asarray(beta).reshape(1, C)

    vmem_cap = _vmem_budget_bytes()
    if max_resident_bytes is None:
        # Resident path needs ~5-7x the slab (in/out double buffers + f32
        # temps); sized from the per-generation VMEM budget.
        max_resident_bytes = vmem_cap // 7

    # Lane-dense refold: fold f = lcm(C, 128)//C consecutive time rows into
    # the channel (lane) dim (pure reshape; (T, C) stays contiguous) so the
    # last dim is a multiple of 128 and output stores are unmasked.
    Tf, Cf, fold = T, C, 1
    if C % 128 != 0:
        f = math.lcm(C, 128) // C
        if 1 < f <= 128 and T % f == 0:
            fold = f
            Tf, Cf = T // f, C * f
            x = x.reshape(B, Tf, Cf)
            gamma2 = jnp.tile(gamma2, (1, fold))
            beta2 = jnp.tile(beta2, (1, fold))
        # else: masked partial stores (perf-only; numerics unaffected).

    slab_bytes = Tf * Cf * max(jnp.dtype(x.dtype).itemsize, 4)
    # On dual-TensorCore chips (v7x) the resident grid (B,) leaves a core idle
    # when B is small; route such slabs to the fully parallel tiled path.
    want_tc_parallel = (_num_tensorcores_per_chip() >= 2 and B < 2
                        and slab_bytes > 2 * 1024 * 1024)

    if slab_bytes <= max_resident_bytes and not want_tc_parallel:
        out = _gln_resident(x, gamma2, beta2, vmem_cap=vmem_cap)
    else:
        out = _gln_tiled(x, gamma2, beta2, true_n=T * C, vmem_cap=vmem_cap,
                         tile_t=tile_t)

    if fold > 1:
        out = out.reshape(B, T, C)
    return out


def reference_gln(x, gamma, beta):
    # Pure-JAX replica of the PyTorch forward, for correctness checking.
    mean = jnp.mean(jnp.mean(x, axis=1, keepdims=True), axis=2, keepdims=True)
    var = jnp.mean(
        jnp.mean((x - mean) ** 2, axis=1, keepdims=True), axis=2, keepdims=True
    )
    return gamma * (x - mean) / jnp.power(var + EPS, 0.5) + beta


if __name__ == "__main__":
    key = jax.random.PRNGKey(0)
    k1, k2, k3, k4, k5 = jax.random.split(key, 5)

    # --- Test 1: module-default params (gamma=1, beta=0), small shape.
    #     Resident path + lane-dense refold (C=32 -> fold 4 -> Cf=128).
    B, T, C = 2, 8, 32
    x = jax.random.normal(k1, (B, T, C), dtype=jnp.float32)
    gamma = jnp.ones((1, 1, C), dtype=jnp.float32)   # reset_parameters(): fill 1
    beta = jnp.zeros((1, 1, C), dtype=jnp.float32)   # reset_parameters(): zero
    out = jax.block_until_ready(global_layer_norm(x, gamma, beta))
    ref = reference_gln(x, gamma, beta)
    assert out.shape == (B, T, C)
    assert jnp.allclose(out, ref, atol=1e-5, rtol=1e-5), "resident path mismatch"

    # --- Test 2: random affine params; force the tiled two-pass path.
    B2, T2, C2 = 2, 64, 128
    x2 = jax.random.normal(k2, (B2, T2, C2), dtype=jnp.float32)
    g2 = jax.random.normal(k3, (1, 1, C2), dtype=jnp.float32)
    b2 = jax.random.normal(k4, (1, 1, C2), dtype=jnp.float32)
    out2 = jax.block_until_ready(
        global_layer_norm(x2, g2, b2, max_resident_bytes=0, tile_t=16))
    ref2 = reference_gln(x2, g2, b2)
    assert out2.shape == (B2, T2, C2)
    assert jnp.allclose(out2, ref2, atol=2e-5, rtol=2e-5), "tiled path mismatch"

    # --- Test 3: tiled path with a T that has no multiple-of-8 divisor
    #     (exercises the zero-pad fallback) and B == 1.
    B3, T3, C3 = 1, 36, 128
    x3 = jax.random.normal(k5, (B3, T3, C3), dtype=jnp.float32)
    g3 = jnp.ones((1, 1, C3), dtype=jnp.float32)
    b3 = jnp.zeros((1, 1, C3), dtype=jnp.float32)
    out3 = jax.block_until_ready(
        global_layer_norm(x3, g3, b3, max_resident_bytes=0))
    ref3 = reference_gln(x3, g3, b3)
    assert out3.shape == (B3, T3, C3)
    assert jnp.allclose(out3, ref3, atol=2e-5, rtol=2e-5), "padded tiled mismatch"

    print("KERNEL_OK")
</pallas_src>

<mosaic_0001>
module attributes {stable_mosaic.version = 11 : i64} {
  func.func @_gln_resident_kernel(%arg0: i32, %arg1: memref<1x2x128xf32, #tpu.memory_space<vmem>>, %arg2: memref<1x128xf32, #tpu.memory_space<vmem>>, %arg3: memref<1x128xf32, #tpu.memory_space<vmem>>, %arg4: memref<1x2x128xf32, #tpu.memory_space<vmem>>) attributes {dimension_semantics = [#tpu.dimension_semantics<parallel>], iteration_bounds = array<i64: 2>, scalar_prefetch = 0 : i64, scratch_operands = 0 : i64, tpu.core_type = #tpu.core_type<tc>, window_params = [{transform_indices = @transform_0, window_bounds = array<i64: 1, 2, 128>}, {pipeline_mode = #tpu.pipeline_mode<synchronous>, transform_indices = @transform_1, window_bounds = array<i64: 1, 128>}, {pipeline_mode = #tpu.pipeline_mode<synchronous>, transform_indices = @transform_2, window_bounds = array<i64: 1, 128>}, {transform_indices = @transform_3, window_bounds = array<i64: 1, 2, 128>}]} {
    %c0 = arith.constant 0 : index
    %c0_0 = arith.constant 0 : index
    %c0_1 = arith.constant 0 : index
    %0 = vector.load %arg1[%c0, %c0_0, %c0_1] : memref<1x2x128xf32, #tpu.memory_space<vmem>>, vector<1x2x128xf32>
    %1 = vector.shape_cast %0 : vector<1x2x128xf32> to vector<2x128xf32>
    %cst = arith.constant dense<0.000000e+00> : vector<128xf32>
    %2 = vector.multi_reduction <add>, %1, %cst [0] : vector<2x128xf32> to vector<128xf32>
    %3 = vector.shape_cast %2 : vector<128xf32> to vector<1x128xf32>
    %4 = vector.shape_cast %3 : vector<1x128xf32> to vector<1x1x128xf32>
    %cst_2 = arith.constant dense<0.000000e+00> : vector<1xf32>
    %5 = vector.multi_reduction <add>, %4, %cst_2 [1, 2] : vector<1x1x128xf32> to vector<1xf32>
    %6 = vector.shape_cast %5 : vector<1xf32> to vector<1x1x1xf32>
    %7 = vector.extract %6[0, 0, 0] : f32 from vector<1x1x1xf32>
    %cst_3 = arith.constant 2.560000e+02 : f32
    %8 = arith.divf %7, %cst_3 : f32
    %9 = vector.broadcast %8 : f32 to vector<2x128xf32>
    %10 = arith.subf %1, %9 : vector<2x128xf32>
    %11 = arith.mulf %10, %10 : vector<2x128xf32>
    %cst_4 = arith.constant dense<0.000000e+00> : vector<128xf32>
    %12 = vector.multi_reduction <add>, %11, %cst_4 [0] : vector<2x128xf32> to vector<128xf32>
    %13 = vector.shape_cast %12 : vector<128xf32> to vector<1x128xf32>
    %14 = vector.shape_cast %13 : vector<1x128xf32> to vector<1x1x128xf32>
    %cst_5 = arith.constant dense<0.000000e+00> : vector<1xf32>
    %15 = vector.multi_reduction <add>, %14, %cst_5 [1, 2] : vector<1x1x128xf32> to vector<1xf32>
    %16 = vector.shape_cast %15 : vector<1xf32> to vector<1x1x1xf32>
    %17 = vector.extract %16[0, 0, 0] : f32 from vector<1x1x1xf32>
    %cst_6 = arith.constant 2.560000e+02 : f32
    %18 = arith.divf %17, %cst_6 : f32
    %cst_7 = arith.constant 9.99999971E-10 : f32
    %19 = arith.addf %18, %cst_7 : f32
    %20 = math.rsqrt %19 : f32
    %c0_8 = arith.constant 0 : index
    %c0_9 = arith.constant 0 : index
    %21 = vector.load %arg2[%c0_8, %c0_9] : memref<1x128xf32, #tpu.memory_space<vmem>>, vector<1x128xf32>
    %22 = vector.broadcast %20 : f32 to vector<1x128xf32>
    %23 = arith.mulf %21, %22 : vector<1x128xf32>
    %c0_10 = arith.constant 0 : index
    %c0_11 = arith.constant 0 : index
    %24 = vector.load %arg3[%c0_10, %c0_11] : memref<1x128xf32, #tpu.memory_space<vmem>>, vector<1x128xf32>
    %25 = vector.broadcast %8 : f32 to vector<1x128xf32>
    %26 = arith.mulf %25, %23 : vector<1x128xf32>
    %27 = arith.subf %24, %26 : vector<1x128xf32>
    %28 = vector.broadcast %23 : vector<1x128xf32> to vector<2x128xf32>
    %29 = arith.mulf %1, %28 : vector<2x128xf32>
    %30 = vector.broadcast %27 : vector<1x128xf32> to vector<2x128xf32>
    %31 = arith.addf %29, %30 : vector<2x128xf32>
    %c0_12 = arith.constant 0 : index
    %c0_13 = arith.constant 0 : index
    %c0_14 = arith.constant 0 : index
    %32 = vector.load %arg4[%c0_12, %c0_13, %c0_14] : memref<1x2x128xf32, #tpu.memory_space<vmem>>, vector<1x2x128xf32>
    %33 = vector.shape_cast %32 : vector<1x2x128xf32> to vector<2x128xf32>
    %34 = vector.shape_cast %31 : vector<2x128xf32> to vector<1x2x128xf32>
    tpu.vector_store %arg4[%c0_12, %c0_13, %c0_14], %34 {strides = array<i32>} : memref<1x2x128xf32, #tpu.memory_space<vmem>>, vector<1x2x128xf32>,
    return
  }
  func.func @transform_0(%arg0: i32) -> (i32, i32, i32) {
    %c0_i32 = arith.constant 0 : i32
    %c0_i32_0 = arith.constant 0 : i32
    %c0_i32_1 = arith.constant 0 : i32
    return %arg0, %c0_i32, %c0_i32_0 : i32, i32, i32
  }
  func.func @transform_1(%arg0: i32) -> (i32, i32) {
    %c0_i32 = arith.constant 0 : i32
    %c0_i32_0 = arith.constant 0 : i32
    %c0_i32_1 = arith.constant 0 : i32
    return %c0_i32, %c0_i32_0 : i32, i32
  }
  func.func @transform_2(%arg0: i32) -> (i32, i32) {
    %c0_i32 = arith.constant 0 : i32
    %c0_i32_0 = arith.constant 0 : i32
    %c0_i32_1 = arith.constant 0 : i32
    return %c0_i32, %c0_i32_0 : i32, i32
  }
  func.func @transform_3(%arg0: i32) -> (i32, i32, i32) {
    %c0_i32 = arith.constant 0 : i32
    %c0_i32_0 = arith.constant 0 : i32
    %c0_i32_1 = arith.constant 0 : i32
    return %arg0, %c0_i32, %c0_i32_0 : i32, i32, i32
  }
}

</mosaic_0001>

<bundles_post_ra>
// kernel: tpu_custom_call.1
= control target key start
LH: loop header
LB: loop body
LE: loop exit
PB: predicated region body
PF: predicated region fallthrough
CT: control target
= control target key end

     0   :  { %8 = vsyncpa [#allocation3], 0  ;;  %s702_s0 = inlined_call_operand.hbm [shape: f32[2,2,128], index: 0, kind: input, shape index: {}]   ;;  %s703_s1 = inlined_call_operand.vmem [shape: f32[1,128], index: 1, kind: input, shape index: {}]   ;;  %s704_s2 = inlined_call_operand.vmem [shape: f32[1,128], index: 2, kind: input, shape index: {}]   ;;  %s705_s3 = inlined_call_operand.hbm [shape: f32[2,2,128], index: 3, kind: output, shape index: {}]  }
   0x1   :  { %10 = vsyncpa [#allocation3 + $0x1], 0 }
   0x2   :  { %11 = vsyncpa [#allocation4], 0 }
   0x3   :  { %13 = vsyncpa [#allocation4 + $0x1], 0  ;;  %s527_s12 = smov 0   ;;  %s529_s13 = smov 0  }
   0x4   :  { %s531_s14 = smov 0   ;;  %s533_s15 = smov 0  }
   0x5 LB: > { %s548_s16 = sadd.s32 4294967295, %s503_s15   ;;  %s341_s17 = sadd.s32 4294967294, %s503_s15   ;;  %s503_s15 = sphi %s533_s15, %s720_s15   ;;  %s499_s14 = sphi %s531_s14, %s719_s14   ;;  %s495_s13 = sphi %s529_s13, %s718_s13   ;;  %s491_s12 = sphi %s527_s12, %s717_s12  }
   0x6   : > { %s552_s18 = sadd.s32 1, %s503_s15   ;;  %s26_s19 = sadd.s32 1, %s499_s14 }
   0x7   : > { %s23_s20 = ssub.s32 %s503_s15, %s552_s18  ;;  %p33_p0 = scmp.ne.s32.totalorder %s499_s14, %s495_s13 }
   0x8   : > { %p24_p1 = scmp.eq.s32.totalorder %s23_s20, 0  ;;  %p34_p2 = scmp.eq.s32.totalorder %s503_s15, 0 }
   0x9   : > { %p39_p3 = scmp.ne.s32.totalorder %s495_s13, %s491_s12  ;;  %p40_p4 = scmp.eq.s32.totalorder %s548_s16, 0 }
   0xa   : > { %s564_s21 = scalar_select %p24_p1, %s499_s14, %s26_s19  }
   0xb   : > { %p566_p5 = por %p34_p2, %p33_p0  ;;  %p570_p6 = por %p40_p4, %p39_p3 }
   0xc   : > { %p105_p7 = scmp.eq.s32.totalorder %s548_s16, 1  ;;  %p111_p8 = scmp.eq.s32.totalorder %s341_s17, 1 }
   0xd   : > { %p371_p10 = scmp.lt.s32.totalorder %s503_s15, 2  ;;  %s137_s26 = sand.u32 1, %s499_s14  }
   0xe   : > { %p577_p11 = por %p105_p7, %p33_p0  ;;  %p581_p12 = por %p111_p8, %p39_p3 }
   0xf   : > { %s345_s27 = sshll.u32 %s503_s15, 5  ;;  %s344_s28 = sshll.u32 %s137_s26, 1 }
  0x10   : > { %s709_s24 = scalar_select %p577_p11, 1, 0 }
  0x11   : > { %s710_s25 = scalar_select %p581_p12, 1, 0 }
  0x12   : > { %s590_s4 = scalar_lea.hbm %s702_s0, %s345_s27  ;;  %s141_s5 = scalar_lea.vmem [#allocation2], %s344_s28 }
  0x13   : > { %s148_s6 = sshll.u32 %s141_s5, 4  ;;  %p594_p13 = pnand %p371_p10, %p566_p5  ;;  %s598_s6 = int_to_ptr.vmem [resolvable:$true] %s148_s6 }
  0x14   : > { %s138_s8 = scalar_lea.sflag [#allocation3], %s137_s26  ;;  %s407_s9 = scalar_lea.hbm %s590_s4, 32 }
  0x15   : > { %p408_p2 = scmp.ne.s32.totalorder %s590_s4, %s407_s9  ;;  %p409_p3 = pneg %p594_p13 }
  0x16   : > { %s412_s17 = scalar_lea.hbm %s702_s0, 64  ;;  %p413_p5 = scmp.lt.u32.totalorder %s590_s4, %s702_s0 }
  0x17   : > { %p410_p4 = pnand %p409_p3, %p408_p2  ;;  %p414_p8 = scmp.lt.u32.totalorder %s412_s17, %s407_s9 }
  0x18   : > { %p416_p9 = scmp.lt.u32.totalorder %s407_s9, %s590_s4 }
  0x19   : > { %p411_p7 = pneg %p410_p4  ;;  %p415_p10 = por %p414_p8, %p413_p5 }
  0x1b   : > { %p417_p0 = por %p416_p9, %p415_p10 }
  0x1d   : > { %p418_p1 = pnand %p417_p0, %p411_p7 }
  0x1f   : > { %421 = shalt.err (!%p418_p1)
}
  0x20   : > { %s422_s22 = scalar_lea.vmem %s598_s6, 32  ;;  %s505_s26 = smov [#allocation2]  }
  0x21   : > { %p423_p2 = scmp.ne.s32.totalorder %s598_s6, %s422_s22  ;;  %s427_s27 = sshll.u32 %s505_s26, 4  ;;  %s428_s27 = int_to_ptr.vmem [resolvable:$false] %s427_s27 }
  0x22   : > { %s429_s28 = scalar_lea.vmem %s428_s27, 64  ;;  %p430_p11 = scmp.lt.s32.totalorder %s598_s6, %s428_s27 }
  0x23   : > { %p425_p4 = pnand %p423_p2, %p409_p3  ;;  %p431_p5 = scmp.lt.s32.totalorder %s429_s28, %s422_s22 }
  0x25   : > { %p426_p12 = pneg %p425_p4  ;;  %p432_p8 = por %p431_p5, %p430_p11 }
  0x27   : > { %p433_p9 = pnand %p432_p8, %p426_p12 }
  0x29   : > { %436 = shalt.err (!%p433_p9)
}
  0x2a   : > { %366 = dma.hbm_to_vmem [thread:$0]  (!%p594_p13), %s590_s4, 32, %s598_s6, %s138_s8  }
  0x2b   : > { %p712_p0 = scmp.lt.s32.totalorder %s503_s15, 3  ;;  %p713_p1 = scmp.ge.s32.totalorder %s503_s15, 1 }
  0x2d   : > { %p154_p3 = pnand %p713_p1, %p712_p0 }
  0x2e   : > { %s632_s29 = sand.u32 (!%p154_p3), 1, %s495_s13  }
  0x2f   : > { %157 = sbr.rel (%p154_p3) target bundleno = 590 (0x24e), region = 32  ;;  %s347_s30 = sshll.u32 (!%p154_p3), %s632_s29, 1 }
  0x30   : > { %s160_s5 = scalar_lea.sflag (!%p154_p3), [#allocation3], %s632_s29  ;;  %s163_s7 = scalar_lea.vmem (!%p154_p3), [#allocation2], %s347_s30 }
  0x36   : > { %482 = dma.done.wait (%p570_p6), %s160_s5, 32  }
  0x37   : > { %484 = vsyncadd (%p570_p6), %s160_s5, 4294967264  ;;  %vm187_vm0 = vcmask 1041408   ;;  %v186_v0 = vld [vmem:[%s163_s7] sm:$0x3]  ;;  %vm195_vm1 = vcmask 1040384   ;;  %v243_v36 = vlaneseq  ;;  %s350_s22 = sshll.u32 %s548_s16, 5 }
  0x38   : > { %v188_v1 = vsel %vm187_vm0, %v186_v0, 0.0  ;;  %v236_v38 = vld [vmem:[%s703_s1] sm:$0x1]  ;;  %s185_s26 = scalar_lea.vmem [#allocation5], %s347_s30  ;;  %s658_s7 = scalar_lea.hbm %s705_s3, %s350_s22 }
  0x39   : > { %v189_v2 = vrot.slane %v188_v1, 4  ;;  %v244_v37 = vshrl.u32 %v243_v36, 7  ;;  %v239_v42 = vld [vmem:[%s704_s2] sm:$0x1]  ;;  %s271_s27 = sshll.u32 %s185_s26, 4  ;;  %p714_p11 = scmp.ne.s32.totalorder %s709_s24, 0  ;;  %s660_s27 = int_to_ptr.vmem [resolvable:$true] %s271_s27 }
  0x3a   : > { %s506_s16 = smov [#allocation5]  }
  0x3b   : > { %v190_v3 = vadd.f32 %v189_v2, %v188_v1  ;;  %v245_v39 = vsub.s32 0, %v244_v37  ;;  %s441_s30 = sshll.u32 %s506_s16, 4  ;;  %s442_s30 = int_to_ptr.vmem [resolvable:$false] %s441_s30 }
  0x3c   : > { %p444_p7 = scmp.lt.s32.totalorder %s660_s27, %s442_s30 }
  0x3d   : > { %v191_v4 = vrot.slane %v190_v3, 2 }
  0x3f   : > { %v192_v5 = vadd.f32 %v191_v4, %v190_v3 }
  0x41   : > { %v193_v6 = vrot.slane %v192_v5, 1 }
  0x43   : > { %v194_v7 = vadd.f32 %v193_v6, %v192_v5 }
  0x45   : > { %v196_v8 = vsel %vm195_vm1, %v194_v7, 0.0 }
  0x46   : > { %197 = vadd.xlane.f32.xlu0 %v196_v8 }
  0xd3   : > { %v198_v9 = vpop.xlane.xlu0 %197 }
  0xd4   : > { %v199_v10 = vrot.slane %v198_v9, 4 }
  0xd6   : > { %v200_v11 = vadd.f32 %v199_v10, %v198_v9 }
  0xd8   : > { %v201_v12 = vrot.slane %v200_v11, 2 }
  0xda   : > { %v202_v13 = vadd.f32 %v201_v12, %v200_v11 }
  0xdc   : > { %v203_v14 = vrot.slane %v202_v13, 1 }
  0xde   : > { %v204_v15 = vadd.f32 %v203_v14, %v202_v13 }
  0xe0   : > { %353 = vpush %v204_v15 }
 0x111   : > { %s354_s23 = spop %353 }
 0x112   : > { %s208_s4 = smul.f32 0.00390625, %s354_s23  ;;  %s258_s23 = scalar_lea.sflag [#allocation4], %s632_s29 }
 0x114   : > { %v209_v16 = vstv %s208_s4  ;;  %s437_s4 = scalar_lea.vmem %s660_s27, 32 }
 0x115   : > { %v210_v17 = vsub.f32 %v186_v0, %v209_v16  ;;  %p438_p6 = scmp.ne.s32.totalorder %s660_s27, %s437_s4 }
 0x117   : > { %v211_v18 = vmul.f32 %v210_v17, %v210_v17  ;;  %p439_p12 = pnand %p438_p6, %p714_p11 }
 0x119   : > { %v212_v19 = vsel %vm187_vm0, %v211_v18, 0.0  ;;  %p440_p13 = pneg %p439_p12 }
 0x11a   : > { %v213_v20 = vrot.slane %v212_v19, 4 }
 0x11c   : > { %v214_v21 = vadd.f32 %v213_v20, %v212_v19 }
 0x11e   : > { %v215_v22 = vrot.slane %v214_v21, 2 }
 0x120   : > { %v216_v23 = vadd.f32 %v215_v22, %v214_v21 }
 0x122   : > { %v217_v24 = vrot.slane %v216_v23, 1 }
 0x124   : > { %v218_v25 = vadd.f32 %v217_v24, %v216_v23 }
 0x126   : > { %v219_v26 = vsel %vm195_vm1, %v218_v25, 0.0 }
 0x127   : > { %220 = vadd.xlane.f32.xlu0 %v219_v26 }
 0x1b4   : > { %v221_v27 = vpop.xlane.xlu0 %220 }
 0x1b5   : > { %v222_v28 = vrot.slane %v221_v27, 4 }
 0x1b7   : > { %v223_v29 = vadd.f32 %v222_v28, %v221_v27 }
 0x1b9   : > { %v224_v30 = vrot.slane %v223_v29, 2 }
 0x1bb   : > { %v225_v31 = vadd.f32 %v224_v30, %v223_v29 }
 0x1bd   : > { %v226_v32 = vrot.slane %v225_v31, 1 }
 0x1bf   : > { %v227_v33 = vadd.f32 %v226_v32, %v225_v31 }
 0x1c1   : > { %355 = vpush %v227_v33 }
 0x1f2   : > { %s356_s6 = spop %355 }
 0x1f3   : > { %s231_s8 = smul.f32 0.00390625, %s356_s6  ;;  %s443_s6 = scalar_lea.vmem %s442_s30, 64 }
 0x1f4   : > { %p445_p10 = scmp.lt.s32.totalorder %s443_s6, %s437_s4 }
 0x1f5   : > { %s232_s9 = sadd.f32 1e-09, %s231_s8 }
 0x1f6   : > { %p446_p2 = por %p445_p10, %p444_p7 }
 0x1f7   : > { %v233_v34 = vstv %s232_s9 }
 0x1f8   : > { %405 = vrsqrt.f32 %v233_v34  ;;  %p447_p4 = pnand %p446_p2, %p440_p13 }
 0x202   : > { %v406_v35 = vpop.eup %405 }
 0x203   : > { %357 = vpush %v406_v35 }
 0x234   : > { %s358_s17 = spop %357 }
 0x235   : > { %v237_v40 = vstv %s358_s17 }
 0x236   : > { %v238_v41 = vmul.f32 %v237_v40, %v236_v38 }
 0x238   : > { %v240_v43 = vmul.f32 %v238_v41, %v209_v16  ;;  %v246_v44 = vrot.slane %v238_v41, %v245_v39 }
 0x23a   : > { %v241_v45 = vsub.f32 %v239_v42, %v240_v43  ;;  %v248_v46 = vmul.f32 %v246_v44, %v186_v0 }
 0x23c   : > { %v253_v47 = vrot.slane %v241_v45, %v245_v39 }
 0x23e   : > { %v255_v48 = vadd.f32 %v253_v47, %v248_v46 }
 0x240   : > { %256 = vst [vmem:[%s185_s26] sm:$0x3] %v255_v48 }
 0x241   : > { %450 = shalt.err (!%p447_p4)
}
 0x242   : > { %s451_s29 = scalar_lea.hbm %s658_s7, 32  ;;  %s455_s10 = scalar_lea.hbm %s705_s3, 64 }
 0x243   : > { %p452_p5 = scmp.ne.s32.totalorder %s658_s7, %s451_s29  ;;  %p456_p0 = scmp.lt.u32.totalorder %s658_s7, %s705_s3 }
 0x244   : > { %p457_p1 = scmp.lt.u32.totalorder %s455_s10, %s451_s29  ;;  %p459_p6 = scmp.lt.u32.totalorder %s451_s29, %s658_s7 }
 0x245   : > { %p453_p8 = pnand %p452_p5, %p714_p11 }
 0x246   : > { %p458_p3 = por %p457_p1, %p456_p0 }
 0x247   : > { %p454_p9 = pneg %p453_p8 }
 0x248   : > { %p460_p12 = por %p459_p6, %p458_p3 }
 0x24a   : > { %p461_p13 = pnand %p460_p12, %p454_p9 }
 0x24c   : > { %464 = shalt.err (!%p461_p13)
}
 0x24d   : > { %361 = dma.vmem_to_hbm [thread:$0]  (%p714_p11), %s660_s27, 32, %s658_s7, %s258_s23  }
 0x24e PF: > { %s283_s19 = sand.u32 1, %s491_s12   ;;  %p715_p7 = scmp.ne.s32.totalorder %s710_s25, 0 }
 0x24f   : > { %p716_p10 = scmp.ge.s32.totalorder %s503_s15, 2  ;;  %s284_s20 = scalar_lea.sflag [#allocation4], %s283_s19 }
 0x251   : > { %p368_p2 = pnand %p716_p10, %p715_p7 }
 0x253   : > { %486 = dma.done.wait (!%p368_p2), %s284_s20, 32  }
 0x254   : > { %488 = vsyncadd (!%p368_p2), %s284_s20, 4294967264  ;;  %p16_p4 = scmp.ge.s32.totalorder %s552_s18, 4   ;;  %s717_s12 = smov %s495_s13 }
 0x255   : > { %s718_s13 = smov %s499_s14  ;;  %s719_s14 = smov %s564_s21 }
 0x256   : > { %s720_s15 = smov %s552_s18  ;;  %18 = sbr.rel (!%p16_p4) target bundleno = 5 (0x5), region = 77 }
 0x25d   :  { %289 = vsyncpa [#allocation3], 1 }
 0x25e   :  { %291 = vsyncpa [#allocation3 + $0x1], 1 }
 0x25f   :  { %292 = vsyncpa [#allocation4], 1 }
 0x260   :  { %294 = vsyncpa [#allocation4 + $0x1], 1 }

</bundles_post_ra>
